<compile_context>
chip_gen: v7x
topology: tpu7x:2x2x1
jax: 0.10.0
libtpu: 0.0.40
codegen_flags: <defaults>
</compile_context>

<pallas_src>
import functools

import jax
import jax.numpy as jnp
from jax.experimental import pallas as pl
from jax.experimental.pallas import tpu as pltpu


# ---------------------------------------------------------------------------
# VMEM budget (generation aware: v5e/v6e = 128 MiB physical, v7x = 64 MiB)
# ---------------------------------------------------------------------------
def _vmem_limit_bytes() -> int:
    try:
        cap = int(pltpu.get_tpu_info().vmem_capacity_bytes)
    except Exception:  # conservative fallback if the query is unavailable
        cap = 64 << 20
    # Never request the whole physical VMEM; leave headroom for the pipeline's
    # double buffers.  (48 MiB on v7x, 96 MiB on v5e/v6e.)
    return min((cap * 3) // 4, 96 << 20)


def _pick_hw_tile(hw: int, c: int, itemsize: int, vmem_limit: int) -> int:
    """Lane-aligned spatial tile so 2x(in) + 2x(out) blocks fit comfortably."""
    if hw <= 128:
        return hw
    per_lane = c * itemsize                      # bytes per lane of a (1,C,t) block
    budget = max(512 * 1024, vmem_limit // 8)    # target bytes per block
    t = min(hw, 4096, budget // per_lane)
    return max(128, (t // 128) * 128)


# ---------------------------------------------------------------------------
# Fused single-pass kernel (small activations: whole x resident, 1R + 1W)
# ---------------------------------------------------------------------------
def _se_fused_kernel(x_ref, w1_ref, b1_ref, w2_ref, b2_ref, o_ref):
    # x_ref: (B, C, HW); weights pre-transposed to (in, out).
    x = x_ref[...]
    # squeeze: global average pool with f32 accumulation (no full-block upcast)
    y = jnp.sum(x, axis=-1, dtype=jnp.float32) / jnp.float32(x.shape[-1])  # (B, C)
    # excitation MLP (tiny; stays f32)
    h = jnp.maximum(
        jnp.dot(y, w1_ref[...], preferred_element_type=jnp.float32) + b1_ref[...],
        0.0)
    g = jax.nn.sigmoid(
        jnp.dot(h, w2_ref[...], preferred_element_type=jnp.float32) + b2_ref[...])
    # scale: cast the gate once and multiply in the input dtype
    o_ref[...] = x * g.astype(o_ref.dtype)[:, :, None]


def _se_fused(x3, w1_t, b1r, w2_t, b2r, vmem_limit):
    B, C, HW = x3.shape
    Cr = w1_t.shape[1]
    itemsize = jnp.dtype(x3.dtype).itemsize
    x_bytes = B * C * HW * itemsize
    return pl.pallas_call(
        _se_fused_kernel,
        out_shape=jax.ShapeDtypeStruct((B, C, HW), x3.dtype),
        in_specs=[
            pl.BlockSpec((B, C, HW), lambda: (0, 0, 0)),
            pl.BlockSpec((C, Cr), lambda: (0, 0)),
            pl.BlockSpec((1, Cr), lambda: (0, 0)),
            pl.BlockSpec((Cr, C), lambda: (0, 0)),
            pl.BlockSpec((1, C), lambda: (0, 0)),
        ],
        out_specs=pl.BlockSpec((B, C, HW), lambda: (0, 0, 0)),
        compiler_params=pltpu.CompilerParams(vmem_limit_bytes=vmem_limit),
        cost_estimate=pl.CostEstimate(
            flops=2 * B * C * HW + 4 * B * C * Cr,
            transcendentals=B * C,
            bytes_accessed=2 * x_bytes),
    )(x3, w1_t, b1r, w2_t, b2r)


# ---------------------------------------------------------------------------
# Streaming path, pass 1: pool + excitation MLP  ->  gate (B, C, 1) f32
# ---------------------------------------------------------------------------
def _se_pool_mlp_kernel(x_ref, w1_ref, b1_ref, w2_ref, b2_ref, g_ref, acc_ref,
                        *, hw, hw_tile):
    j = pl.program_id(1)

    @pl.when(j == 0)
    def _init():
        acc_ref[...] = jnp.zeros_like(acc_ref)

    x = x_ref[...]                                           # (1, C, hw_tile)
    if hw % hw_tile != 0:
        # last spatial tile is partial: mask out-of-range lanes before summing
        lane = jax.lax.broadcasted_iota(jnp.int32, x.shape, dimension=2)
        valid = (j * hw_tile + lane) < hw
        x = jnp.where(valid, x, jnp.zeros_like(x))
    acc_ref[...] += jnp.sum(x, axis=-1, dtype=jnp.float32)   # (1, C)

    @pl.when(j == pl.num_programs(1) - 1)
    def _finalize():
        y = acc_ref[...] / jnp.float32(hw)                   # (1, C) mean
        h = jnp.maximum(
            jnp.dot(y, w1_ref[...], preferred_element_type=jnp.float32)
            + b1_ref[...], 0.0)
        g = jax.nn.sigmoid(
            jnp.dot(h, w2_ref[...], preferred_element_type=jnp.float32)
            + b2_ref[...])
        g_ref[...] = g[:, :, None]                           # (1, C, 1)


# ---------------------------------------------------------------------------
# Streaming path, pass 2: tiled elementwise scale  out = x * gate
# ---------------------------------------------------------------------------
def _se_scale_kernel(x_ref, g_ref, o_ref):
    # x_ref: (1, C, t); g_ref: (1, C, 1) f32 gate; broadcast along lanes.
    o_ref[...] = x_ref[...] * g_ref[...].astype(o_ref.dtype)


def _se_streaming(x3, w1_t, b1r, w2_t, b2r, vmem_limit, hw_tile=None):
    B, C, HW = x3.shape
    Cr = w1_t.shape[1]
    itemsize = jnp.dtype(x3.dtype).itemsize
    t = hw_tile if hw_tile is not None else _pick_hw_tile(HW, C, itemsize, vmem_limit)
    n_tiles = pl.cdiv(HW, t)
    x_bytes = B * C * HW * itemsize
    w_bytes = (C * Cr + Cr * C + Cr + C) * 4

    # pass 1: per-(b, c) gate.  Reduction over HW tiles is the inner
    # ("arbitrary") axis; batch is "parallel" (independent per-b reductions).
    gate = pl.pallas_call(
        functools.partial(_se_pool_mlp_kernel, hw=HW, hw_tile=t),
        out_shape=jax.ShapeDtypeStruct((B, C, 1), jnp.float32),
        grid=(B, n_tiles),
        in_specs=[
            pl.BlockSpec((1, C, t), lambda b, j: (b, 0, j)),
            pl.BlockSpec((C, Cr), lambda b, j: (0, 0)),   # weights stay resident
            pl.BlockSpec((1, Cr), lambda b, j: (0, 0)),
            pl.BlockSpec((Cr, C), lambda b, j: (0, 0)),
            pl.BlockSpec((1, C), lambda b, j: (0, 0)),
        ],
        out_specs=pl.BlockSpec((1, C, 1), lambda b, j: (b, 0, 0)),
        scratch_shapes=[pltpu.VMEM((1, C), jnp.float32)],
        compiler_params=pltpu.CompilerParams(
            dimension_semantics=("parallel", "arbitrary"),
            vmem_limit_bytes=vmem_limit),
        cost_estimate=pl.CostEstimate(
            flops=B * C * HW + 4 * B * C * Cr,
            transcendentals=B * C,
            bytes_accessed=x_bytes + w_bytes + B * C * 4),
    )(x3, w1_t, b1r, w2_t, b2r)

    # pass 2: stream x again and apply the gate (fully parallel, pipelined).
    out3 = pl.pallas_call(
        _se_scale_kernel,
        out_shape=jax.ShapeDtypeStruct((B, C, HW), x3.dtype),
        grid=(B, n_tiles),
        in_specs=[
            pl.BlockSpec((1, C, t), lambda b, j: (b, 0, j)),
            pl.BlockSpec((1, C, 1), lambda b, j: (b, 0, 0)),
        ],
        out_specs=pl.BlockSpec((1, C, t), lambda b, j: (b, 0, j)),
        compiler_params=pltpu.CompilerParams(
            dimension_semantics=("parallel", "parallel"),
            vmem_limit_bytes=vmem_limit),
        cost_estimate=pl.CostEstimate(
            flops=B * C * HW,
            transcendentals=0,
            bytes_accessed=2 * x_bytes + B * C * 4),
    )(x3, gate)
    return out3


# ---------------------------------------------------------------------------
# Public wrapper
# ---------------------------------------------------------------------------
def se_layer(x, w1, b1, w2, b2, *, force_streaming=False, hw_tile=None):
    """x: (B, C, H, W) NCHW; w1: (Cr, C), b1: (Cr,), w2: (C, Cr), b2: (C,)
    (PyTorch nn.Linear convention: weight is (out_features, in_features))."""
    B, C, H, W = x.shape
    HW = H * W
    Cr = w1.shape[0]

    x3 = x.reshape(B, C, HW)
    w1_t = w1.T                     # (C, Cr)
    w2_t = w2.T                     # (Cr, C)
    b1r = b1.reshape(1, Cr)
    b2r = b2.reshape(1, C)

    vmem_limit = _vmem_limit_bytes()
    x_bytes = B * C * HW * jnp.dtype(x.dtype).itemsize

    # fused single pass (1R+1W) only if the whole activation comfortably fits;
    # otherwise stream it in two gridded, pipelined passes (2R+1W).
    use_fused = (not force_streaming) and (2 * x_bytes <= vmem_limit // 2)
    if use_fused:
        out3 = _se_fused(x3, w1_t, b1r, w2_t, b2r, vmem_limit)
    else:
        out3 = _se_streaming(x3, w1_t, b1r, w2_t, b2r, vmem_limit, hw_tile)
    return out3.reshape(B, C, H, W)


def _reference(x, w1, b1, w2, b2):
    """Pure-JAX reference matching the PyTorch module exactly."""
    y = jnp.mean(x, axis=(2, 3))                 # (B, C)
    y = jnp.maximum(y @ w1.T + b1, 0.0)          # (B, Cr)
    y = jax.nn.sigmoid(y @ w2.T + b2)            # (B, C)
    return x * y[:, :, None, None]


if __name__ == "__main__":
    # SElayer(channel=32, reduction=16) -> hidden = 32 // 16 = 2
    B, C, H, W = 2, 32, 16, 16
    reduction = 16
    Cr = C // reduction

    key = jax.random.PRNGKey(0)
    kx, k1, k2, k3, k4 = jax.random.split(key, 5)

    x = jax.random.normal(kx, (B, C, H, W), dtype=jnp.float32)
    # deterministic synthetic parameters (nn.Linear shapes: (out, in), (out,))
    w1 = jax.random.normal(k1, (Cr, C), dtype=jnp.float32) * 0.1
    b1 = jax.random.normal(k2, (Cr,), dtype=jnp.float32) * 0.1
    w2 = jax.random.normal(k3, (C, Cr), dtype=jnp.float32) * 0.1
    b2 = jax.random.normal(k4, (C,), dtype=jnp.float32) * 0.1

    ref = _reference(x, w1, b1, w2, b2)

    # default dispatch (small activation -> fused single-pass kernel)
    out = jax.block_until_ready(se_layer(x, w1, b1, w2, b2))
    assert out.shape == (B, C, H, W)
    assert jnp.allclose(out, ref, atol=1e-5, rtol=1e-5)

    # exercise the gridded, pipelined streaming path with multiple HW tiles
    out_s = jax.block_until_ready(
        se_layer(x, w1, b1, w2, b2, force_streaming=True, hw_tile=128))
    assert jnp.allclose(out_s, ref, atol=1e-5, rtol=1e-5)

    # non-lane-aligned spatial size (exercises the partial-tile masking path)
    x2 = jax.random.normal(kx, (B, C, 12, 12), dtype=jnp.float32)
    ref2 = _reference(x2, w1, b1, w2, b2)
    out2 = jax.block_until_ready(
        se_layer(x2, w1, b1, w2, b2, force_streaming=True, hw_tile=128))
    assert jnp.allclose(out2, ref2, atol=1e-5, rtol=1e-5)

    print("KERNEL_OK")
</pallas_src>

<mosaic_0001>
module attributes {stable_mosaic.version = 11 : i64} {
  func.func @_se_fused_kernel(%arg0: memref<2x32x256xf32, #tpu.memory_space<vmem>>, %arg1: memref<32x2xf32, #tpu.memory_space<vmem>>, %arg2: memref<1x2xf32, #tpu.memory_space<vmem>>, %arg3: memref<2x32xf32, #tpu.memory_space<vmem>>, %arg4: memref<1x32xf32, #tpu.memory_space<vmem>>, %arg5: memref<2x32x256xf32, #tpu.memory_space<vmem>>) attributes {dimension_semantics = [], scalar_prefetch = 0 : i64, scratch_operands = 0 : i64, tpu.core_type = #tpu.core_type<tc>} {
    %c0 = arith.constant 0 : index
    %c0_0 = arith.constant 0 : index
    %c0_1 = arith.constant 0 : index
    %0 = vector.load %arg0[%c0, %c0_0, %c0_1] : memref<2x32x256xf32, #tpu.memory_space<vmem>>, vector<2x32x256xf32>
    %cst = arith.constant dense<0.000000e+00> : vector<2x32xf32>
    %1 = vector.multi_reduction <add>, %0, %cst [2] : vector<2x32x256xf32> to vector<2x32xf32>
    %cst_2 = arith.constant 2.560000e+02 : f32
    %2 = vector.broadcast %cst_2 : f32 to vector<2x32xf32>
    %3 = arith.divf %1, %2 : vector<2x32xf32>
    %c0_3 = arith.constant 0 : index
    %c0_4 = arith.constant 0 : index
    %4 = vector.load %arg1[%c0_3, %c0_4] : memref<32x2xf32, #tpu.memory_space<vmem>>, vector<32x2xf32>
    %cst_5 = arith.constant dense<0.000000e+00> : vector<2x2xf32>
    %5 = tpu.matmul %3, %4, %cst_5 {dimension_numbers = #tpu.dot_dimension_numbers<[1], [0], [0], [1], [0, 0, 1, 1], [], []>} : vector<2x32xf32>, vector<32x2xf32>, vector<2x2xf32> -> vector<2x2xf32>
    %c0_6 = arith.constant 0 : index
    %c0_7 = arith.constant 0 : index
    %6 = vector.load %arg2[%c0_6, %c0_7] : memref<1x2xf32, #tpu.memory_space<vmem>>, vector<1x2xf32>
    %7 = vector.broadcast %6 : vector<1x2xf32> to vector<2x2xf32>
    %8 = arith.addf %5, %7 : vector<2x2xf32>
    %cst_8 = arith.constant 0.000000e+00 : f32
    %9 = vector.broadcast %cst_8 : f32 to vector<2x2xf32>
    %10 = arith.maximumf %8, %9 : vector<2x2xf32>
    %c0_9 = arith.constant 0 : index
    %c0_10 = arith.constant 0 : index
    %11 = vector.load %arg3[%c0_9, %c0_10] : memref<2x32xf32, #tpu.memory_space<vmem>>, vector<2x32xf32>
    %cst_11 = arith.constant dense<0.000000e+00> : vector<2x32xf32>
    %12 = tpu.matmul %10, %11, %cst_11 {dimension_numbers = #tpu.dot_dimension_numbers<[1], [0], [0], [1], [0, 0, 1, 1], [], []>} : vector<2x2xf32>, vector<2x32xf32>, vector<2x32xf32> -> vector<2x32xf32>
    %c0_12 = arith.constant 0 : index
    %c0_13 = arith.constant 0 : index
    %13 = vector.load %arg4[%c0_12, %c0_13] : memref<1x32xf32, #tpu.memory_space<vmem>>, vector<1x32xf32>
    %14 = vector.broadcast %13 : vector<1x32xf32> to vector<2x32xf32>
    %15 = arith.addf %12, %14 : vector<2x32xf32>
    %16 = arith.negf %15 : vector<2x32xf32>
    %17 = math.exp %16 : vector<2x32xf32>
    %cst_14 = arith.constant 1.000000e+00 : f32
    %18 = vector.broadcast %cst_14 : f32 to vector<2x32xf32>
    %19 = arith.addf %18, %17 : vector<2x32xf32>
    %20 = arith.divf %18, %19 : vector<2x32xf32>
    %21 = vector.shape_cast %20 : vector<2x32xf32> to vector<2x32x1xf32>
    %22 = vector.broadcast %21 : vector<2x32x1xf32> to vector<2x32x256xf32>
    %23 = arith.mulf %0, %22 : vector<2x32x256xf32>
    %c0_15 = arith.constant 0 : index
    %c0_16 = arith.constant 0 : index
    %c0_17 = arith.constant 0 : index
    %24 = vector.load %arg5[%c0_15, %c0_16, %c0_17] : memref<2x32x256xf32, #tpu.memory_space<vmem>>, vector<2x32x256xf32>
    tpu.vector_store %arg5[%c0_15, %c0_16, %c0_17], %23 {strides = array<i32>} : memref<2x32x256xf32, #tpu.memory_space<vmem>>, vector<2x32x256xf32>,
    return
  }
}

</mosaic_0001>

<bundles_post_ra>
// kernel: tpu_custom_call.1
= control target key start
LH: loop header
LB: loop body
LE: loop exit
PB: predicated region body
PF: predicated region fallthrough
CT: control target
= control target key end

     0   :  { %10 = vsyncpa [#allocation3], 0  ;;  %s658_s0 = inlined_call_operand.hbm [shape: f32[2,32,256], index: 0, kind: input, shape index: {}]   ;;  %s659_s1 = inlined_call_operand.vmem [shape: f32[32,2], index: 1, kind: input, shape index: {}]   ;;  %s660_s2 = inlined_call_operand.vmem [shape: f32[1,2], index: 2, kind: input, shape index: {}]   ;;  %s661_s3 = inlined_call_operand.vmem [shape: f32[2,32], index: 3, kind: input, shape index: {}]   ;;  %s662_s4 = inlined_call_operand.vmem [shape: f32[1,32], index: 4, kind: input, shape index: {}]   ;;  %s663_s5 = inlined_call_operand.hbm [shape: f32[2,32,256], index: 5, kind: output, shape index: {}]  }
   0x1   :  { %11 = vsyncpa [#allocation4], 0  ;;  %s498_s18 = smov [#allocation2]   ;;  %s450_s22 = scalar_lea.hbm %s658_s0, 2048 }
   0x2   :  { %s17_s19 = sshll.u32 %s498_s18, 4  ;;  %p451_p0 = scmp.ne.s32.totalorder %s658_s0, %s450_s22  ;;  %s18_s19 = int_to_ptr.vmem [resolvable:$true] %s17_s19 }
   0x3   :  { %p454_p1 = scmp.lt.u32.totalorder %s450_s22, %s658_s0 }
   0x5   :  { %p456_p2 = pnand %p454_p1, %p451_p0 }
   0x7   :  { %459 = shalt.err (!%p456_p2)
}
   0x8   :  { %s460_s27 = scalar_lea.vmem %s18_s19, 2048  ;;  %p465_p4 = scmp.lt.s32.totalorder %s18_s19, %s18_s19 }
   0x9   :  { %p461_p3 = scmp.ne.s32.totalorder %s18_s19, %s460_s27  ;;  %p466_p5 = scmp.lt.s32.totalorder %s460_s27, %s460_s27 }
   0xb   :  { %p467_p6 = por %p466_p5, %p465_p4 }
   0xd   :  { %p468_p7 = pnand %p467_p6, %p461_p3 }
   0xf   :  { %471 = shalt.err (!%p468_p7)
}
  0x10   :  { %s499_s28 = smov 256   ;;  %s500_s29 = smov 16  }
  0x11   :  { %23 = dma.hbm_to_vmem [thread:$0]  %s658_s0, 2048, %s18_s19, [#allocation3], %s499_s28, %s499_s28, %s500_s29  }
  0x12   :  { %494 = dma.done.wait [#allocation3], 2048  }
  0x13   :  { %495 = vsyncadd [#allocation3], 4294965248  ;;  %v550_v0 = vld [vmem:[#allocation2 + $0x40] sm:$0xff]  ;;  %v552_v1 = vld [vmem:[#allocation2 + $0x48] sm:$0xff]  ;;  %v501_v27 = vmov 0.0|0.0   ;;  %vm502_vm0 = vmmov 0   ;;  %v103_v32 = vlaneseq }
  0x14   :  { %v554_v2 = vld [vmem:[#allocation2] sm:$0xff]  ;;  %v63_v3 = vadd.f32 %v552_v1, %v550_v0  ;;  %v558_v4 = vld [vmem:[#allocation2 + $0x8] sm:$0xff]  ;;  %v560_v5 = vld [vmem:[#allocation2 + $0x50] sm:$0xff]  ;;  %433 = vmatprep.subr.bf16.mxu0 %v501_v27  ;;  %v503_v31 = vmov 0.0   ;;  %vm114_vm1 = vcmask 130112   ;;  %vm121_vm2 = vcmask 195712  }
  0x15   :  { %v562_v6 = vld [vmem:[#allocation2 + $0x58] sm:$0xff]  ;;  %v51_v7 = vadd.f32 %v558_v4, %v554_v2  ;;  %v566_v8 = vld [vmem:[#allocation2 + $0x10] sm:$0xff]  ;;  %v574_v12 = vld [vmem:[#allocation2 + $0x60] sm:$0xff]  ;;  %425 = vmatprep.mubr.msk.f32.mxu0 %vm502_vm0, %v503_v31  ;;  %428 = vmatprep.subr.mxu1 %v503_v31  ;;  %v104_v34 = vand.u32 127, %v103_v32  ;;  %v610_v39 = vshrl.u32 %v103_v32, 7  ;;  %vm128_vm3 = vcmask 261312  }
  0x16   :  { %v568_v9 = vld [vmem:[#allocation2 + $0x18] sm:$0xff]  ;;  %64 = vadd.xlane.f32.xlu1 %v63_v3  ;;  %v66_v10 = vadd.f32 %v562_v6, %v560_v5  ;;  %v576_v13 = vld [vmem:[#allocation2 + $0x68] sm:$0xff]  ;;  %v578_v14 = vld [vmem:[#allocation2 + $0x20] sm:$0xff]  ;;  %430 = vmatprep.mubr.msk.f32.mxu1 %vm502_vm0, %v503_v31  ;;  %vm149_vm4 = vcmask 1041409   ;;  %vm151_vm5 = vcmask 261120   ;;  %vm237_vm6 = vcmask 1041408  }
  0x17   :  { %52 = vadd.xlane.f32.xlu0 %v51_v7  ;;  %v54_v11 = vadd.f32 %v568_v9, %v566_v8  ;;  %v580_v15 = vld [vmem:[#allocation2 + $0x28] sm:$0xff]  ;;  %v69_v16 = vadd.f32 %v576_v13, %v574_v12  ;;  %v586_v18 = vld [vmem:[#allocation2 + $0x70] sm:$0xff]  ;;  %v588_v19 = vld [vmem:[#allocation2 + $0x78] sm:$0xff]  ;;  %v109_v36 = vadd.s32 4294967288, %v104_v34  ;;  %v116_v38 = vadd.s32 4294967280, %v104_v34 }
  0x18   :  { %v57_v17 = vadd.f32 %v580_v15, %v578_v14  ;;  %v590_v20 = vld [vmem:[#allocation2 + $0x30] sm:$0xff]  ;;  %v592_v21 = vld [vmem:[#allocation2 + $0x38] sm:$0xff]  ;;  %v72_v22 = vadd.f32 %v588_v19, %v586_v18  ;;  %v84_v24 = vld [vmem:[%s659_s1] sm:$0xff]  ;;  %v123_v43 = vadd.s32 4294967272, %v104_v34  ;;  %v107_v47 = vsub.s32 %v104_v34, %v610_v39 }
  0x19   :  { %v60_v23 = vadd.f32 %v592_v21, %v590_v20  ;;  %v85_v25 = vld [vmem:[%s659_s1 + $0x8] sm:$0xff]  ;;  %v86_v28 = vld [vmem:[%s659_s1 + $0x10] sm:$0xff]  ;;  %v87_v29 = vld [vmem:[%s659_s1 + $0x18] sm:$0xff]  ;;  %v112_v41 = vsub.s32 %v109_v36, %v610_v39  ;;  %v119_v45 = vsub.s32 %v116_v38, %v610_v39  ;;  %vm233_vm7 = vcmask 15360  }
  0x1a   :  { %67 = vadd.xlane.f32.xlu1 %v66_v10  ;;  %v434_v26 = vpack.c.bf16 %v85_v25, %v84_v24  ;;  %v437_v30 = vpack.c.bf16 %v87_v29, %v86_v28  ;;  %v126_v54 = vsub.s32 %v123_v43, %v610_v39  ;;  %v225_v25 = vld [vmem:[%s661_s3] sm:$0x3]  ;;  %v319_v38 = vsub.s32 0, %v610_v39 }
  0x1b   :  { %55 = vadd.xlane.f32.xlu0 %v54_v11  ;;  %429 = vmatpush3.msk.msra.mxu1 %vm237_vm6, %v225_v25  ;;  %v406_v31 = vld [vmem:[%s662_s4] ss:$0 sm:$0xff] }
  0x1c   :  { %435 = vmatpush3.bf16.msra.mxu0 %v434_v26  ;;  %v404_v26 = vld [vmem:[%s660_s2] ss:$0 sm:$0xff]  ;;  %s504_s2 = smov [#allocation5]  }
  0x1d   :  { %436 = vmatprep.subr.bf16.mxu0 %v501_v27  ;;  %s392_s3 = sshll.u32 %s504_s2, 4  ;;  %s393_s3 = int_to_ptr.vmem [resolvable:$true] %s392_s3 }
  0x1e   :  { %70 = vadd.xlane.f32.xlu1 %v69_v16  ;;  %s472_s4 = scalar_lea.vmem %s393_s3, 2048  ;;  %p477_p9 = scmp.lt.s32.totalorder %s393_s3, %s393_s3 }
  0x1f   :  { %58 = vadd.xlane.f32.xlu0 %v57_v17  ;;  %p473_p8 = scmp.ne.s32.totalorder %s393_s3, %s472_s4  ;;  %p478_p10 = scmp.lt.s32.totalorder %s472_s4, %s472_s4 }
  0x20   :  { %438 = vmatpush3.bf16.msra.mxu0 %v437_v30 }
  0x21   :  { %p479_p11 = por %p478_p10, %p477_p9 }
  0x22   :  { %73 = vadd.xlane.f32.xlu1 %v72_v22 }
  0x23   :  { %61 = vadd.xlane.f32.xlu0 %v60_v23  ;;  %p480_p12 = pnand %p479_p11, %p473_p8 }
  0xa3   :  { %v65_v33 = vpop.xlane.xlu1 %64 }
  0xa4   :  { %v53_v35 = vpop.xlane.xlu0 %52  ;;  %v80_v48 = vmul.f32 0.00390625, %v65_v33 }
  0xa5   :  { %v76_v51 = vmul.f32 0.00390625, %v53_v35 }
  0xa6   :  { %v133_v58 = vrot.slane %v80_v48, %v107_v47 }
  0xa7   :  { %v68_v37 = vpop.xlane.xlu1 %67  ;;  %v108_v62 = vrot.slane %v76_v51, %v107_v47 }
  0xa8   :  { %v56_v40 = vpop.xlane.xlu0 %55  ;;  %v81_v42 = vmul.f32 0.00390625, %v68_v37 }
  0xa9   :  { %v77_v44 = vmul.f32 0.00390625, %v56_v40 }
  0xaa   :  { %v137_v53 = vrot.slane %v81_v42, %v112_v41  ;;  %v338_v42 = vsub.s32 1, %v610_v39 }
  0xab   :  { %v71_v46 = vpop.xlane.xlu1 %70  ;;  %v113_v55 = vrot.slane %v77_v44, %v112_v41 }
  0xac   :  { %v82_v49 = vmul.f32 0.00390625, %v71_v46  ;;  %v59_v50 = vpop.xlane.xlu0 %58  ;;  %v138_v3 = vsel %vm114_vm1, %v137_v53, %v133_v58 }
  0xad   :  { %v78_v52 = vmul.f32 0.00390625, %v59_v50  ;;  %v115_v10 = vsel %vm114_vm1, %v113_v55, %v108_v62 }
  0xae   :  { %v142_v56 = vrot.slane %v82_v49, %v119_v45 }
  0xaf   :  { %v74_v57 = vpop.xlane.xlu1 %73  ;;  %v120_v59 = vrot.slane %v78_v52, %v119_v45 }
  0xb0   :  { %v83_v60 = vmul.f32 0.00390625, %v74_v57  ;;  %v62_v61 = vpop.xlane.xlu0 %61  ;;  %v143_v11 = vsel %vm121_vm2, %v142_v56, %v138_v3 }
  0xb1   :  { %v79_v63 = vmul.f32 0.00390625, %v62_v61  ;;  %v122_v17 = vsel %vm121_vm2, %v120_v59, %v115_v10 }
  0xb2   :  { %v147_v7 = vrot.slane %v83_v60, %v126_v54 }
  0xb3   :  { %v127_v16 = vrot.slane %v79_v63, %v126_v54 }
  0xb4   :  { %v148_v22 = vsel %vm128_vm3, %v147_v7, %v143_v11 }
  0xb5   :  { %v129_v23 = vsel %vm128_vm3, %v127_v16, %v122_v17 }
  0xb6   :  { %v150_v24 = vsel %vm149_vm4, %v148_v22, %v129_v23 }
  0xb7   :  { %426 = vmatmul.mubr.msk.f32.vlgmr.msra.gmra.mrb[0].mxu0 %vm151_vm5, %v150_v24 }
 0x18a   :  { %v220_v27 = vpop.f32.mrb[0].mxu0 }
 0x18b   :  { %v221_v28 = vadd.f32 %v404_v26, %v220_v27  ;;  %v427_v29 = vpop.f32.mrb[1].mxu0 }
 0x18d   :  { %v224_v30 = vmax.f32 %v221_v28, 0.0 }
 0x18f   :  { %431 = vmatmul.mubr.msk.f32.vlgmr.msra.gmra.mrb[0].mxu1 %vm233_vm7, %v224_v30 }
 0x262   :  { %v307_v32 = vpop.f32.mrb[0].mxu1 }
 0x263   :  { %v308_v33 = vadd.f32 %v406_v31, %v307_v32  ;;  %v432_v34 = vpop.f32.mrb[1].mxu1 }
 0x265   :  { %v409_v35 = vmul.f32 -1.442695, %v308_v33 }
 0x267   :  { %446 = vpow2.f32 %v409_v35 }
 0x271   :  { %v447_v36 = vpop.eup %446 }
 0x272   :  { %v314_v37 = vadd.f32 1.0, %v447_v36 }
 0x274   :  { %448 = vrcp.f32 %v314_v37 }
 0x27e   :  { %v449_v40 = vpop.eup %448 }
 0x27f   :  { %v320_v41 = vrot.slane %v449_v40, %v319_v38  ;;  %v339_v43 = vrot.slane %v449_v40, %v338_v42 }
 0x281   :  { %326 = vbcast.lane.b32.xlu1 %v320_v41, 264  ;;  %322 = vbcast.lane.b32.xlu0 %v320_v41, 256 }
 0x285   :  { %330 = vbcast.lane.b32.xlu1 %v320_v41, 272  ;;  %341 = vbcast.lane.b32.xlu0 %v339_v43, 256 }
 0x289   :  { %334 = vbcast.lane.b32.xlu1 %v320_v41, 280  ;;  %349 = vbcast.lane.b32.xlu0 %v339_v43, 272 }
 0x28d   :  { %345 = vbcast.lane.b32.xlu1 %v339_v43, 264 }
 0x291   :  { %353 = vbcast.lane.b32.xlu1 %v339_v43, 280 }
 0x2f3   :  { %v327_v44 = vpop.permute.xlu1 %326  ;;  %v323_v45 = vpop.permute.xlu0 %322 }
 0x2f4   :  { %v357_v46 = vmul.f32 %v327_v44, %v566_v8  ;;  %v358_v47 = vmul.f32 %v327_v44, %v568_v9  ;;  %v355_v48 = vmul.f32 %v323_v45, %v554_v2  ;;  %v356_v49 = vmul.f32 %v323_v45, %v558_v4 }
 0x2f6   :  { %373 = vst [vmem:[#allocation5 + $0x10] sm:$0xff] %v357_v46  ;;  %374 = vst [vmem:[#allocation5 + $0x18] sm:$0xff] %v358_v47 }
 0x2f7   :  { %371 = vst [vmem:[#allocation5] sm:$0xff] %v355_v48  ;;  %372 = vst [vmem:[#allocation5 + $0x8] sm:$0xff] %v356_v49  ;;  %v331_v39 = vpop.permute.xlu1 %330  ;;  %v342_v50 = vpop.permute.xlu0 %341 }
 0x2f8   :  { %v359_v51 = vmul.f32 %v331_v39, %v578_v14  ;;  %v360_v52 = vmul.f32 %v331_v39, %v580_v15  ;;  %v363_v53 = vmul.f32 %v342_v50, %v550_v0  ;;  %v364_v8 = vmul.f32 %v342_v50, %v552_v1 }
 0x2fa   :  { %375 = vst [vmem:[#allocation5 + $0x20] sm:$0xff] %v359_v51  ;;  %376 = vst [vmem:[#allocation5 + $0x28] sm:$0xff] %v360_v52 }
 0x2fb   :  { %379 = vst [vmem:[#allocation5 + $0x40] sm:$0xff] %v363_v53  ;;  %380 = vst [vmem:[#allocation5 + $0x48] sm:$0xff] %v364_v8  ;;  %v335_v2 = vpop.permute.xlu1 %334  ;;  %v350_v4 = vpop.permute.xlu0 %349 }
 0x2fc   :  { %v361_v9 = vmul.f32 %v335_v2, %v590_v20  ;;  %v362_v54 = vmul.f32 %v335_v2, %v592_v21  ;;  %v367_v55 = vmul.f32 %v350_v4, %v574_v12  ;;  %v368_v14 = vmul.f32 %v350_v4, %v576_v13 }
 0x2fe   :  { %377 = vst [vmem:[#allocation5 + $0x30] sm:$0xff] %v361_v9  ;;  %378 = vst [vmem:[#allocation5 + $0x38] sm:$0xff] %v362_v54 }
 0x2ff   :  { %383 = vst [vmem:[#allocation5 + $0x60] sm:$0xff] %v367_v55  ;;  %384 = vst [vmem:[#allocation5 + $0x68] sm:$0xff] %v368_v14  ;;  %v346_v0 = vpop.permute.xlu1 %345 }
 0x300   :  { %v365_v1 = vmul.f32 %v346_v0, %v560_v5  ;;  %v366_v15 = vmul.f32 %v346_v0, %v562_v6 }
 0x302   :  { %381 = vst [vmem:[#allocation5 + $0x50] sm:$0xff] %v365_v1  ;;  %382 = vst [vmem:[#allocation5 + $0x58] sm:$0xff] %v366_v15 }
 0x303   :  { %v354_v20 = vpop.permute.xlu1 %353 }
 0x304   :  { %v369_v21 = vmul.f32 %v354_v20, %v586_v18  ;;  %v370_v12 = vmul.f32 %v354_v20, %v588_v19 }
 0x306   :  { %385 = vst [vmem:[#allocation5 + $0x70] sm:$0xff] %v369_v21  ;;  %386 = vst [vmem:[#allocation5 + $0x78] sm:$0xff] %v370_v12 }
 0x307   :  { %483 = shalt.err (!%p480_p12)
}
 0x308   :  { %s484_s21 = scalar_lea.hbm %s663_s5, 2048 }
 0x309   :  { %p485_p13 = scmp.ne.s32.totalorder %s663_s5, %s484_s21  ;;  %p488_p0 = scmp.lt.u32.totalorder %s484_s21, %s663_s5 }
 0x30b   :  { %p490_p1 = pnand %p488_p0, %p485_p13 }
 0x30d   :  { %493 = shalt.err (!%p490_p1)
}
 0x30e   :  { %398 = dma.vmem_to_hbm [thread:$0]  %s393_s3, 2048, %s663_s5, [#allocation4], %s499_s28, %s499_s28, %s500_s29  }
 0x30f   :  { %496 = dma.done.wait [#allocation4], 2048  }
 0x310   :  { %497 = vsyncadd [#allocation4], 4294965248 }
 0x311   :  { %402 = vsyncpa [#allocation3], 1 }
 0x312   :  { %403 = vsyncpa [#allocation4], 1 }

</bundles_post_ra>
